<compile_context>
chip_gen: v7x
topology: tpu7x:2x2x1
jax: 0.10.0
libtpu: 0.0.40
codegen_flags: <defaults>
</compile_context>

<pallas_src>
import functools

import jax
import jax.numpy as jnp
from jax import lax
from jax.experimental import pallas as pl
from jax.experimental.pallas import tpu as pltpu


def _conv3x3_bias_prelu_kernel(x_ref, w_ref, b_ref, m_ref, alpha_ref, o_ref,
                               col_ref, *, W, L):
    # x_ref    : (Cin, L)       VMEM  input block, L = images_per_step * H * W (lane dense)
    # w_ref    : (Cout, 9*Cin)  VMEM  weights, column index = (kh*3+kw)*Cin + c (resident)
    # b_ref    : (Cout, 1)      VMEM  bias (resident)
    # m_ref    : (9, L)         VMEM  {0,1} per-tap validity masks (resident, precomputed)
    # alpha_ref: (1,)           SMEM  shared PReLU slope
    # o_ref    : (Cout, L)      VMEM  conv output (pre pixel-shuffle), lane dense
    # col_ref  : (9*Cin, L)     VMEM  im2col slab (scratch)
    Cin = x_ref.shape[0]
    x = x_ref[...]

    # im2col: col[(kh*3+kw)*Cin + c, q] = x[c, q + dh*W + dw] if the tap is inside the
    # image else 0.  pltpu.roll (== jnp.roll semantics, runs on the XLU) realizes the
    # static lane offset; circular wrap / cross-row / cross-image bleed happen exactly
    # on the lanes the mask zeroes, so no halo buffer, zero fill, or staging copy is
    # needed.
    for kh in range(3):
        for kw in range(3):
            dh = kh - 1
            dw = kw - 1
            off = dh * W + dw
            k = kh * 3 + kw
            if off == 0:
                tap = x                                       # center tap: always valid
            else:
                tap = pltpu.roll(x, shift=(-off) % L, axis=1)
                tap = tap * m_ref[k:k + 1, :]                 # (1, L) broadcast, one VPU mul
            # TODO(synk): with Cin=4 these are 4-sublane masked stores; moot for
            # production SRGAN Cin (=64, a multiple of 8).
            col_ref[k * Cin:(k + 1) * Cin, :] = tap

    # Single K = 9*Cin matmul; result keeps L on the lane axis -> unmasked lane-dense store.
    acc = jnp.dot(w_ref[...], col_ref[...], preferred_element_type=jnp.float32)
    acc = acc + b_ref[...]                                    # (Cout, 1) broadcast over lanes

    # Shared-scalar PReLU commutes with the PixelShuffle permutation.
    alpha = alpha_ref[0]
    acc = jnp.where(acc >= 0, acc, alpha * acc)

    o_ref[...] = acc.astype(o_ref.dtype)                      # single lane-dense store


def _images_per_step(n, hw, lane_target=512):
    """Largest divisor B of n with B*hw around the 512+ lane sweet spot."""
    b = max(1, min(n, lane_target // hw if hw else 1))
    while n % b:
        b -= 1
    return b


def upsample_block(x_nchw, w_oihw, bias, alpha, up_scale):
    """Forward pass of UpsampleBLock. x_nchw: (N, Cin, H, W) f32 -> (N, Cin, H*r, W*r)."""
    N, Cin, H, W = x_nchw.shape
    Cout = w_oihw.shape[0]
    r = up_scale
    assert Cout == Cin * r * r
    HW = H * W

    # Fold B images per grid step onto the lane axis (amortizes per-step overhead and
    # the weight load; widens stores toward the 512+ lane sweet spot).
    B = _images_per_step(N, HW)
    G = N // B
    L = B * HW

    # (Cin, N*HW) layout: one small input-sized transpose so the batch folds onto lanes
    # and every later reshape is free/contiguous.
    x_lanes = jnp.transpose(x_nchw.reshape(N, Cin, HW), (1, 0, 2)).reshape(Cin, N * HW)
    x_lanes = x_lanes.astype(jnp.float32)

    # Weight as one (Cout, 9*Cin) matrix, column index = (kh*3 + kw)*Cin + c.
    w2 = jnp.transpose(w_oihw, (0, 2, 3, 1)).reshape(Cout, 9 * Cin).astype(jnp.float32)
    b2 = bias.reshape(Cout, 1).astype(jnp.float32)
    alpha1 = jnp.asarray(alpha, jnp.float32).reshape(1)

    # Per-tap validity masks, built ONCE here (no per-step iota / int-div / compares in
    # the kernel).  Depends only on the spatial position within an image, so the same
    # (9, L) block serves every grid step via a constant index_map (VMEM resident).
    p = jnp.arange(L, dtype=jnp.int32) % HW
    hh = p // W
    ww = p % W
    rows = []
    for kh in range(3):
        for kw in range(3):
            dh, dw = kh - 1, kw - 1
            rows.append((hh + dh >= 0) & (hh + dh < H) & (ww + dw >= 0) & (ww + dw < W))
    mask = jnp.stack(rows, axis=0).astype(jnp.float32)        # (9, L)

    kernel = functools.partial(_conv3x3_bias_prelu_kernel, W=W, L=L)

    # Explicit VMEM budget (v5e scoped default is only 16 MiB; v7x physical is 64 MiB).
    f32 = 4
    est = f32 * (2 * Cin * L + Cout * 9 * Cin + Cout + 9 * L + 2 * Cout * L + 9 * Cin * L)
    vmem_limit = int(min(max(4 * est, 16 * 1024 * 1024), 64 * 1024 * 1024))

    conv = pl.pallas_call(
        kernel,
        out_shape=jax.ShapeDtypeStruct((Cout, N * HW), jnp.float32),
        grid_spec=pltpu.PrefetchScalarGridSpec(
            num_scalar_prefetch=0,
            grid=(G,),
            in_specs=[
                pl.BlockSpec((Cin, L), lambda g: (0, g)),
                pl.BlockSpec((Cout, 9 * Cin), lambda g: (0, 0)),
                pl.BlockSpec((Cout, 1), lambda g: (0, 0)),
                pl.BlockSpec((9, L), lambda g: (0, 0)),
                pl.BlockSpec(memory_space=pltpu.MemorySpace.SMEM),
            ],
            out_specs=pl.BlockSpec((Cout, L), lambda g: (0, g)),
            scratch_shapes=[
                pltpu.VMEM((9 * Cin, L), jnp.float32),        # im2col slab
            ],
        ),
        compiler_params=pltpu.CompilerParams(
            dimension_semantics=("parallel",),
            vmem_limit_bytes=vmem_limit),
    )(x_lanes, w2, b2, mask, alpha1)

    # PixelShuffle from the kernel's (Cout, N, H, W) layout:
    #   y[n, c, h*r + i, w*r + j] = conv[c*r*r + i*r + j, n, h, w]
    # The reshapes are free (contiguous); only the transpose below is an XLA copy.
    # TODO(synk): fusing the width (j) interleave into the kernel store — so the
    # remaining transpose moves whole rows of length W*r — needs a lane-strided
    # scatter store with no clean/robust Pallas TPU expression today.
    # TODO(synk): for production SRGAN shapes (Cin=64, H=W>=96) add an HW tile axis to
    # the grid (per-tile masks/rolls) so col + double-buffered output fit v7x's 64 MiB
    # VMEM and both TensorCores stay busy when N is small.
    C = Cout // (r * r)
    y = conv.reshape(C, r, r, N, H, W)
    y = jnp.transpose(y, (3, 0, 4, 1, 5, 2)).reshape(N, C, H * r, W * r)
    return y


def _reference(x_nchw, w_oihw, bias, alpha, r):
    """Pure-JAX reference matching PyTorch semantics (NCHW)."""
    y = lax.conv_general_dilated(
        x_nchw, w_oihw, window_strides=(1, 1), padding=((1, 1), (1, 1)),
        dimension_numbers=("NCHW", "OIHW", "NCHW"))
    y = y + bias.reshape(1, -1, 1, 1)
    N, C2, H, W = y.shape
    C = C2 // (r * r)
    y = y.reshape(N, C, r, r, H, W)
    y = jnp.transpose(y, (0, 1, 4, 2, 5, 3)).reshape(N, C, H * r, W * r)
    y = jnp.where(y >= 0, y, alpha * y)
    return y


if __name__ == "__main__":
    # Module config: in_channels=4, up_scale=2 -> conv out channels = 16.
    N, Cin, H, W = 2, 4, 16, 16
    up_scale = 2
    Cout = Cin * up_scale ** 2

    key = jax.random.PRNGKey(0)
    kx, kw, kb = jax.random.split(key, 3)

    x = jax.random.normal(kx, (N, Cin, H, W), dtype=jnp.float32)
    # Deterministic synthetic parameters (shapes match nn.Conv2d(Cin, Cin*r^2, 3, padding=1)).
    fan_in = Cin * 3 * 3
    bound = 1.0 / (fan_in ** 0.5)
    w_oihw = jax.random.uniform(kw, (Cout, Cin, 3, 3), jnp.float32, -bound, bound)
    bias = jax.random.uniform(kb, (Cout,), jnp.float32, -bound, bound)
    alpha = jnp.float32(0.25)  # nn.PReLU() default single shared parameter

    out = jax.block_until_ready(upsample_block(x, w_oihw, bias, alpha, up_scale))

    ref = _reference(x, w_oihw, bias, alpha, up_scale)
    assert out.shape == (N, Cin, H * up_scale, W * up_scale), out.shape
    err = float(jnp.max(jnp.abs(out - ref)))
    assert jnp.allclose(out, ref, atol=1e-4, rtol=1e-4), err

    print("KERNEL_OK")
</pallas_src>

<mosaic_0001>
module attributes {stable_mosaic.version = 11 : i64} {
  func.func @_conv3x3_bias_prelu_kernel(%arg0: i32, %arg1: memref<4x512xf32, #tpu.memory_space<vmem>>, %arg2: memref<16x36xf32, #tpu.memory_space<vmem>>, %arg3: memref<16x1xf32, #tpu.memory_space<vmem>>, %arg4: memref<9x512xf32, #tpu.memory_space<vmem>>, %arg5: memref<1xf32, #tpu.memory_space<smem>>, %arg6: memref<16x512xf32, #tpu.memory_space<vmem>>, %arg7: memref<36x512xf32, #tpu.memory_space<vmem>>) attributes {dimension_semantics = [#tpu.dimension_semantics<parallel>], iteration_bounds = array<i64: 1>, scalar_prefetch = 0 : i64, scratch_operands = 1 : i64, tpu.core_type = #tpu.core_type<tc>, window_params = [{transform_indices = @transform_0, window_bounds = array<i64: 4, 512>}, {pipeline_mode = #tpu.pipeline_mode<synchronous>, transform_indices = @transform_1, window_bounds = array<i64: 16, 36>}, {pipeline_mode = #tpu.pipeline_mode<synchronous>, transform_indices = @transform_2, window_bounds = array<i64: 16, 1>}, {pipeline_mode = #tpu.pipeline_mode<synchronous>, transform_indices = @transform_3, window_bounds = array<i64: 9, 512>}, {transform_indices = @transform_4, window_bounds = array<i64: 1>}, {transform_indices = @transform_5, window_bounds = array<i64: 16, 512>}]} {
    %c0 = arith.constant 0 : index
    %c0_0 = arith.constant 0 : index
    %0 = vector.load %arg1[%c0, %c0_0] : memref<4x512xf32, #tpu.memory_space<vmem>>, vector<4x512xf32>
    %c17_i32 = arith.constant 17 : i32
    %1 = tpu.dynamic_rotate %0 by %c17_i32 dim 1 : vector<4x512xf32>, i32 -> vector<4x512xf32>
    %c0_1 = arith.constant 0 : index
    %c0_2 = arith.constant 0 : index
    %2 = vector.load %arg4[%c0_1, %c0_2] : memref<9x512xf32, #tpu.memory_space<vmem>>, vector<1x512xf32>
    %3 = vector.broadcast %2 : vector<1x512xf32> to vector<4x512xf32>
    %4 = arith.mulf %1, %3 : vector<4x512xf32>
    %c0_3 = arith.constant 0 : index
    %c0_4 = arith.constant 0 : index
    %5 = vector.load %arg7[%c0_3, %c0_4] : memref<36x512xf32, #tpu.memory_space<vmem>>, vector<4x512xf32>
    tpu.vector_store %arg7[%c0_3, %c0_4], %4 {strides = array<i32>} : memref<36x512xf32, #tpu.memory_space<vmem>>, vector<4x512xf32>,
    %c16_i32 = arith.constant 16 : i32
    %6 = tpu.dynamic_rotate %0 by %c16_i32 dim 1 : vector<4x512xf32>, i32 -> vector<4x512xf32>
    %c1 = arith.constant 1 : index
    %c0_5 = arith.constant 0 : index
    %7 = vector.load %arg4[%c1, %c0_5] : memref<9x512xf32, #tpu.memory_space<vmem>>, vector<1x512xf32>
    %8 = vector.broadcast %7 : vector<1x512xf32> to vector<4x512xf32>
    %9 = arith.mulf %6, %8 : vector<4x512xf32>
    %c4 = arith.constant 4 : index
    %c0_6 = arith.constant 0 : index
    %10 = vector.load %arg7[%c4, %c0_6] : memref<36x512xf32, #tpu.memory_space<vmem>>, vector<4x512xf32>
    tpu.vector_store %arg7[%c4, %c0_6], %9 {strides = array<i32>} : memref<36x512xf32, #tpu.memory_space<vmem>>, vector<4x512xf32>,
    %c15_i32 = arith.constant 15 : i32
    %11 = tpu.dynamic_rotate %0 by %c15_i32 dim 1 : vector<4x512xf32>, i32 -> vector<4x512xf32>
    %c2 = arith.constant 2 : index
    %c0_7 = arith.constant 0 : index
    %12 = vector.load %arg4[%c2, %c0_7] : memref<9x512xf32, #tpu.memory_space<vmem>>, vector<1x512xf32>
    %13 = vector.broadcast %12 : vector<1x512xf32> to vector<4x512xf32>
    %14 = arith.mulf %11, %13 : vector<4x512xf32>
    %c8 = arith.constant 8 : index
    %c0_8 = arith.constant 0 : index
    %15 = vector.load %arg7[%c8, %c0_8] : memref<36x512xf32, #tpu.memory_space<vmem>>, vector<4x512xf32>
    tpu.vector_store %arg7[%c8, %c0_8], %14 {strides = array<i32>} : memref<36x512xf32, #tpu.memory_space<vmem>>, vector<4x512xf32>,
    %c1_i32 = arith.constant 1 : i32
    %16 = tpu.dynamic_rotate %0 by %c1_i32 dim 1 : vector<4x512xf32>, i32 -> vector<4x512xf32>
    %c3 = arith.constant 3 : index
    %c0_9 = arith.constant 0 : index
    %17 = vector.load %arg4[%c3, %c0_9] : memref<9x512xf32, #tpu.memory_space<vmem>>, vector<1x512xf32>
    %18 = vector.broadcast %17 : vector<1x512xf32> to vector<4x512xf32>
    %19 = arith.mulf %16, %18 : vector<4x512xf32>
    %c12 = arith.constant 12 : index
    %c0_10 = arith.constant 0 : index
    %20 = vector.load %arg7[%c12, %c0_10] : memref<36x512xf32, #tpu.memory_space<vmem>>, vector<4x512xf32>
    tpu.vector_store %arg7[%c12, %c0_10], %19 {strides = array<i32>} : memref<36x512xf32, #tpu.memory_space<vmem>>, vector<4x512xf32>,
    %c16 = arith.constant 16 : index
    %c0_11 = arith.constant 0 : index
    %21 = vector.load %arg7[%c16, %c0_11] : memref<36x512xf32, #tpu.memory_space<vmem>>, vector<4x512xf32>
    tpu.vector_store %arg7[%c16, %c0_11], %0 {strides = array<i32>} : memref<36x512xf32, #tpu.memory_space<vmem>>, vector<4x512xf32>,
    %c511_i32 = arith.constant 511 : i32
    %22 = tpu.dynamic_rotate %0 by %c511_i32 dim 1 : vector<4x512xf32>, i32 -> vector<4x512xf32>
    %c5 = arith.constant 5 : index
    %c0_12 = arith.constant 0 : index
    %23 = vector.load %arg4[%c5, %c0_12] : memref<9x512xf32, #tpu.memory_space<vmem>>, vector<1x512xf32>
    %24 = vector.broadcast %23 : vector<1x512xf32> to vector<4x512xf32>
    %25 = arith.mulf %22, %24 : vector<4x512xf32>
    %c20 = arith.constant 20 : index
    %c0_13 = arith.constant 0 : index
    %26 = vector.load %arg7[%c20, %c0_13] : memref<36x512xf32, #tpu.memory_space<vmem>>, vector<4x512xf32>
    tpu.vector_store %arg7[%c20, %c0_13], %25 {strides = array<i32>} : memref<36x512xf32, #tpu.memory_space<vmem>>, vector<4x512xf32>,
    %c497_i32 = arith.constant 497 : i32
    %27 = tpu.dynamic_rotate %0 by %c497_i32 dim 1 : vector<4x512xf32>, i32 -> vector<4x512xf32>
    %c6 = arith.constant 6 : index
    %c0_14 = arith.constant 0 : index
    %28 = vector.load %arg4[%c6, %c0_14] : memref<9x512xf32, #tpu.memory_space<vmem>>, vector<1x512xf32>
    %29 = vector.broadcast %28 : vector<1x512xf32> to vector<4x512xf32>
    %30 = arith.mulf %27, %29 : vector<4x512xf32>
    %c24 = arith.constant 24 : index
    %c0_15 = arith.constant 0 : index
    %31 = vector.load %arg7[%c24, %c0_15] : memref<36x512xf32, #tpu.memory_space<vmem>>, vector<4x512xf32>
    tpu.vector_store %arg7[%c24, %c0_15], %30 {strides = array<i32>} : memref<36x512xf32, #tpu.memory_space<vmem>>, vector<4x512xf32>,
    %c496_i32 = arith.constant 496 : i32
    %32 = tpu.dynamic_rotate %0 by %c496_i32 dim 1 : vector<4x512xf32>, i32 -> vector<4x512xf32>
    %c7 = arith.constant 7 : index
    %c0_16 = arith.constant 0 : index
    %33 = vector.load %arg4[%c7, %c0_16] : memref<9x512xf32, #tpu.memory_space<vmem>>, vector<1x512xf32>
    %34 = vector.broadcast %33 : vector<1x512xf32> to vector<4x512xf32>
    %35 = arith.mulf %32, %34 : vector<4x512xf32>
    %c28 = arith.constant 28 : index
    %c0_17 = arith.constant 0 : index
    %36 = vector.load %arg7[%c28, %c0_17] : memref<36x512xf32, #tpu.memory_space<vmem>>, vector<4x512xf32>
    tpu.vector_store %arg7[%c28, %c0_17], %35 {strides = array<i32>} : memref<36x512xf32, #tpu.memory_space<vmem>>, vector<4x512xf32>,
    %c495_i32 = arith.constant 495 : i32
    %37 = tpu.dynamic_rotate %0 by %c495_i32 dim 1 : vector<4x512xf32>, i32 -> vector<4x512xf32>
    %c8_18 = arith.constant 8 : index
    %c0_19 = arith.constant 0 : index
    %38 = vector.load %arg4[%c8_18, %c0_19] : memref<9x512xf32, #tpu.memory_space<vmem>>, vector<1x512xf32>
    %39 = vector.broadcast %38 : vector<1x512xf32> to vector<4x512xf32>
    %40 = arith.mulf %37, %39 : vector<4x512xf32>
    %c32 = arith.constant 32 : index
    %c0_20 = arith.constant 0 : index
    %41 = vector.load %arg7[%c32, %c0_20] : memref<36x512xf32, #tpu.memory_space<vmem>>, vector<4x512xf32>
    tpu.vector_store %arg7[%c32, %c0_20], %40 {strides = array<i32>} : memref<36x512xf32, #tpu.memory_space<vmem>>, vector<4x512xf32>,
    %c0_21 = arith.constant 0 : index
    %c0_22 = arith.constant 0 : index
    %42 = vector.load %arg2[%c0_21, %c0_22] : memref<16x36xf32, #tpu.memory_space<vmem>>, vector<16x36xf32>
    %c0_23 = arith.constant 0 : index
    %c0_24 = arith.constant 0 : index
    %43 = vector.load %arg7[%c0_23, %c0_24] : memref<36x512xf32, #tpu.memory_space<vmem>>, vector<36x512xf32>
    %cst = arith.constant dense<0.000000e+00> : vector<16x512xf32>
    %44 = tpu.matmul %42, %43, %cst {dimension_numbers = #tpu.dot_dimension_numbers<[1], [0], [0], [1], [0, 0, 1, 1], [], []>} : vector<16x36xf32>, vector<36x512xf32>, vector<16x512xf32> -> vector<16x512xf32>
    %c0_25 = arith.constant 0 : index
    %c0_26 = arith.constant 0 : index
    %45 = vector.load %arg3[%c0_25, %c0_26] : memref<16x1xf32, #tpu.memory_space<vmem>>, vector<16x1xf32>
    %46 = vector.broadcast %45 : vector<16x1xf32> to vector<16x512xf32>
    %47 = arith.addf %44, %46 : vector<16x512xf32>
    %c0_27 = arith.constant 0 : index
    %48 = memref.load %arg5[%c0_27] : memref<1xf32, #tpu.memory_space<smem>>
    %cst_28 = arith.constant 0.000000e+00 : f32
    %49 = vector.broadcast %cst_28 : f32 to vector<16x512xf32>
    %50 = arith.cmpf oge, %47, %49 : vector<16x512xf32>
    %51 = vector.broadcast %48 : f32 to vector<16x512xf32>
    %52 = arith.mulf %51, %47 : vector<16x512xf32>
    %53 = arith.select %50, %47, %52 : vector<16x512xi1>, vector<16x512xf32>
    %c0_29 = arith.constant 0 : index
    %c0_30 = arith.constant 0 : index
    %54 = vector.load %arg6[%c0_29, %c0_30] : memref<16x512xf32, #tpu.memory_space<vmem>>, vector<16x512xf32>
    tpu.vector_store %arg6[%c0_29, %c0_30], %53 {strides = array<i32>} : memref<16x512xf32, #tpu.memory_space<vmem>>, vector<16x512xf32>,
    return
  }
  func.func @transform_0(%arg0: i32) -> (i32, i32) {
    %c0_i32 = arith.constant 0 : i32
    %c0_i32_0 = arith.constant 0 : i32
    return %c0_i32, %arg0 : i32, i32
  }
  func.func @transform_1(%arg0: i32) -> (i32, i32) {
    %c0_i32 = arith.constant 0 : i32
    %c0_i32_0 = arith.constant 0 : i32
    %c0_i32_1 = arith.constant 0 : i32
    return %c0_i32, %c0_i32_0 : i32, i32
  }
  func.func @transform_2(%arg0: i32) -> (i32, i32) {
    %c0_i32 = arith.constant 0 : i32
    %c0_i32_0 = arith.constant 0 : i32
    %c0_i32_1 = arith.constant 0 : i32
    return %c0_i32, %c0_i32_0 : i32, i32
  }
  func.func @transform_3(%arg0: i32) -> (i32, i32) {
    %c0_i32 = arith.constant 0 : i32
    %c0_i32_0 = arith.constant 0 : i32
    %c0_i32_1 = arith.constant 0 : i32
    return %c0_i32, %c0_i32_0 : i32, i32
  }
  func.func @transform_4(%arg0: i32) -> i32 {
    %c0_i32 = arith.constant 0 : i32
    %c0_i32_0 = arith.constant 0 : i32
    return %c0_i32 : i32
  }
  func.func @transform_5(%arg0: i32) -> (i32, i32) {
    %c0_i32 = arith.constant 0 : i32
    %c0_i32_0 = arith.constant 0 : i32
    return %c0_i32, %arg0 : i32, i32
  }
}

</mosaic_0001>

<bundles_post_ra>
// kernel: tpu_custom_call.1
= control target key start
LH: loop header
LB: loop body
LE: loop exit
PB: predicated region body
PF: predicated region fallthrough
CT: control target
= control target key end

     0   :  { %11 = vsyncpa [#allocation5], 0  ;;  %s1062_s0 = inlined_call_operand.vmem [shape: f32[4,512], index: 0, kind: input, shape index: {}]   ;;  %s1063_s1 = inlined_call_operand.hbm [shape: f32[16,36], index: 1, kind: input, shape index: {}]   ;;  %s1064_s2 = inlined_call_operand.vmem [shape: f32[16,1], index: 2, kind: input, shape index: {}]   ;;  %s1065_s3 = inlined_call_operand.hbm [shape: f32[9,512], index: 3, kind: input, shape index: {}]   ;;  %s1066_s4 = inlined_call_operand.<no memory space> [shape: f32[1], index: 4, kind: input, shape index: {}]   ;;  %s1067_s5 = inlined_call_operand.hbm [shape: f32[16,512], index: 5, kind: output, shape index: {}]  }
   0x1   :  { %12 = vsyncpa [#allocation8], 0 }
   0x2   :  { %13 = vsyncpa [#allocation6], 0  ;;  %s840_s18 = smov [#allocation4]   ;;  %s768_s22 = scalar_lea.hbm %s1063_s1, 256 }
   0x3   :  { %s21_s19 = sshll.u32 %s840_s18, 4  ;;  %p769_p0 = scmp.ne.s32.totalorder %s1063_s1, %s768_s22  ;;  %s22_s19 = int_to_ptr.vmem [resolvable:$true] %s21_s19 }
   0x4   :  { %p772_p1 = scmp.lt.u32.totalorder %s768_s22, %s1063_s1 }
   0x6   :  { %p774_p2 = pnand %p772_p1, %p769_p0 }
   0x8   :  { %777 = shalt.err (!%p774_p2)
}
   0x9   :  { %s778_s27 = scalar_lea.vmem %s22_s19, 256  ;;  %p783_p4 = scmp.lt.s32.totalorder %s22_s19, %s22_s19 }
   0xa   :  { %p779_p3 = scmp.ne.s32.totalorder %s22_s19, %s778_s27  ;;  %p784_p5 = scmp.lt.s32.totalorder %s778_s27, %s778_s27 }
   0xc   :  { %p785_p6 = por %p784_p5, %p783_p4 }
   0xe   :  { %p786_p7 = pnand %p785_p6, %p779_p3 }
  0x10   :  { %789 = shalt.err (!%p786_p7)
}
  0x11   :  { %s841_s28 = smov 128   ;;  %s842_s29 = smov 8  }
  0x12   :  { %27 = dma.hbm_to_vmem [thread:$0]  %s1063_s1, 256, %s22_s19, [#allocation5], %s841_s28, %s841_s28, %s842_s29  }
  0x13   :  { %s843_s7 = smov [#allocation7]   ;;  %s790_s11 = scalar_lea.hbm %s1065_s3, 1024 }
  0x14   :  { %s35_s8 = sshll.u32 %s843_s7, 4  ;;  %p791_p8 = scmp.ne.s32.totalorder %s1065_s3, %s790_s11  ;;  %s36_s8 = int_to_ptr.vmem [resolvable:$true] %s35_s8 }
  0x15   :  { %p794_p9 = scmp.lt.u32.totalorder %s790_s11, %s1065_s3 }
  0x17   :  { %p796_p10 = pnand %p794_p9, %p791_p8 }
  0x19   :  { %799 = shalt.err (!%p796_p10)
}
  0x1a   :  { %s800_s16 = scalar_lea.vmem %s36_s8, 1024  ;;  %p805_p12 = scmp.lt.s32.totalorder %s36_s8, %s36_s8 }
  0x1b   :  { %p801_p11 = scmp.ne.s32.totalorder %s36_s8, %s800_s16  ;;  %p806_p13 = scmp.lt.s32.totalorder %s800_s16, %s800_s16 }
  0x1d   :  { %p807_p0 = por %p806_p13, %p805_p12 }
  0x1f   :  { %p808_p1 = pnand %p807_p0, %p801_p11 }
  0x21   :  { %811 = shalt.err (!%p808_p1)
}
  0x22   :  { %s844_s1 = smov 512   ;;  %s845_s17 = smov 32  }
  0x23   :  { %41 = dma.hbm_to_vmem [thread:$0]  %s1065_s3, 1024, %s36_s8, [#allocation8], %s844_s1, %s844_s1, %s845_s17  }
  0x24   :  { %834 = dma.done.wait [#allocation5], 256  }
  0x25   :  { %835 = vsyncadd [#allocation5], 4294967040 }
  0x26   :  { %836 = dma.done.wait [#allocation8], 1024  }
  0x27   :  { %837 = vsyncadd [#allocation8], 4294966272  ;;  %v51_v0 = vld [vmem:[%s1062_s0 + $0x8] sm:$0xff]  ;;  %v50_v1 = vld [vmem:[%s1062_s0] sm:$0xff]  ;;  %s846_s24 = smov 16   ;;  %s847_s3 = smov 1   ;;  %v66_v8 = vlaneseq }
  0x28   :  { %107 = vrot.lane.b32.xlu1 %v51_v0, %s846_s24  ;;  %261 = vst [vmem:[#allocation2 + $0x50] sm:$0xf] %v51_v0  ;;  %103 = vrot.lane.b32.xlu0 %v50_v1, %s846_s24  ;;  %259 = vst [vmem:[#allocation2 + $0x40] sm:$0xf] %v50_v1  ;;  %v55_v2 = vcombine.high %v51_v0, %v51_v0  ;;  %v54_v3 = vcombine.high %v50_v1, %v50_v1  ;;  %s848_s25 = smov 17   ;;  %s849_s0 = smov 15  }
  0x29   :  { %s850_s26 = smov 127   ;;  %s851_s27 = smov 112   ;;  %v854_v4 = vmov 0.0   ;;  %v485_v5 = vld [vmem:[%s1064_s2] sm:$0xff]  ;;  %v486_v6 = vld [vmem:[%s1064_s2 + $0x8] sm:$0xff]  ;;  %v855_v7 = vmov 0  }
  0x2a   :  { %262 = vst [vmem:[#allocation2 + $0x58] sm:$0xf] %v55_v2  ;;  %260 = vst [vmem:[#allocation2 + $0x48] sm:$0xf] %v54_v3  ;;  %s852_s28 = smov 113   ;;  %s853_s29 = smov 111   ;;  %581 = vmatprep.mubr.f32.mxu0 %v854_v4  ;;  %658 = vmatprep.mubr.f32.mxu1 %v854_v4 }
  0x2b   :  { %764 = vset.pattern.permute.xlu0 %v855_v7  ;;  %765 = vset.pattern.permute.xlu1 %v855_v7  ;;  %v76_v9 = vshrl.u32 %v66_v8, 7  ;;  %v928_v10 = vand.u32 127, %v66_v8  ;;  %v117_v13 = vld [vmem:[#allocation7 + $0x1] ss:$8 sm:$0xf]  ;;  %vm504_vm8 = vcmask 1043456  }
  0x2c   :  { %109 = vrot.lane.b32.xlu1 %v55_v2, %s846_s24  ;;  %203 = vrot.lane.b32.xlu0 %v50_v1, %s847_s3  ;;  %v217_v19 = vld [vmem:[#allocation7 + $0x3] ss:$8 sm:$0xf]  ;;  %v73_v43 = vld [vmem:[#allocation7] ss:$8 sm:$0xf] }
  0x2d   :  { %v930_v11 = vsub.s32 0, %v76_v9  ;;  %v932_v12 = vsub.s32 3, %v76_v9  ;;  %v934_v16 = vsub.s32 1, %v76_v9  ;;  %vm111_vm0 = vcmp.lt.s32.totalorder %v928_v10, 16 }
  0x2e   :  { %v939_v20 = vsub.s32 2, %v76_v9  ;;  %vm211_vm1 = vcmp.lt.s32.totalorder %v928_v10, 1  ;;  %vm68_vm2 = vcmp.lt.s32.totalorder %v928_v10, 17  ;;  %vm167_vm3 = vcmp.lt.s32.totalorder %v928_v10, 15 }
  0x2f   :  { %v122_v17 = vrot.slane %v117_v13, %v930_v11  ;;  %v134_v18 = vrot.slane %v117_v13, %v932_v12  ;;  %v226_v25 = vrot.slane %v217_v19, %v934_v16  ;;  %v126_v28 = vrot.slane %v117_v13, %v934_v16 }
  0x30   :  { %205 = vrot.lane.b32.xlu1 %v54_v3, %s847_s3  ;;  %105 = vrot.lane.b32.xlu0 %v54_v3, %s846_s24  ;;  %v130_v29 = vrot.slane %v117_v13, %v939_v20  ;;  %v222_v34 = vrot.slane %v217_v19, %v930_v11  ;;  %v230_v38 = vrot.slane %v217_v19, %v939_v20  ;;  %vm271_vm4 = vcmp.lt.s32.totalorder %v928_v10, 127 }
  0x31   :  { %v234_v42 = vrot.slane %v217_v19, %v932_v12  ;;  %v82_v55 = vrot.slane %v73_v43, %v934_v16  ;;  %v78_v63 = vrot.slane %v73_v43, %v930_v11  ;;  %vm371_vm5 = vcmp.lt.s32.totalorder %v928_v10, 112 }
  0x32   :  { %vm327_vm6 = vcmp.lt.s32.totalorder %v928_v10, 113  ;;  %vm427_vm7 = vcmp.lt.s32.totalorder %v928_v10, 111  ;;  %v463_v10 = vld [vmem:[#allocation4] sm:$0xff]  ;;  %vm497_vm9 = vcmask 293888  }
  0x34   :  { %209 = vrot.lane.b32.xlu1 %v55_v2, %s847_s3  ;;  %207 = vrot.lane.b32.xlu0 %v51_v0, %s847_s3 }
  0x38   :  { %60 = vrot.lane.b32.xlu1 %v54_v3, %s848_s25  ;;  %58 = vrot.lane.b32.xlu0 %v50_v1, %s848_s25 }
  0x3c   :  { %64 = vrot.lane.b32.xlu1 %v55_v2, %s848_s25  ;;  %62 = vrot.lane.b32.xlu0 %v51_v0, %s848_s25 }
  0x40   :  { %161 = vrot.lane.b32.xlu1 %v54_v3, %s849_s0  ;;  %159 = vrot.lane.b32.xlu0 %v50_v1, %s849_s0 }
  0x44   :  { %165 = vrot.lane.b32.xlu1 %v55_v2, %s849_s0  ;;  %163 = vrot.lane.b32.xlu0 %v51_v0, %s849_s0 }
  0x48   :  { %265 = vrot.lane.b32.xlu1 %v54_v3, %s850_s26  ;;  %263 = vrot.lane.b32.xlu0 %v50_v1, %s850_s26 }
  0x4c   :  { %269 = vrot.lane.b32.xlu1 %v55_v2, %s850_s26  ;;  %267 = vrot.lane.b32.xlu0 %v51_v0, %s850_s26 }
  0x50   :  { %365 = vrot.lane.b32.xlu1 %v54_v3, %s851_s27  ;;  %363 = vrot.lane.b32.xlu0 %v50_v1, %s851_s27 }
  0x54   :  { %369 = vrot.lane.b32.xlu1 %v55_v2, %s851_s27  ;;  %367 = vrot.lane.b32.xlu0 %v51_v0, %s851_s27 }
  0x58   :  { %321 = vrot.lane.b32.xlu1 %v54_v3, %s852_s28  ;;  %319 = vrot.lane.b32.xlu0 %v50_v1, %s852_s28 }
  0x5c   :  { %325 = vrot.lane.b32.xlu1 %v55_v2, %s852_s28  ;;  %323 = vrot.lane.b32.xlu0 %v51_v0, %s852_s28 }
  0x60   :  { %421 = vrot.lane.b32.xlu1 %v54_v3, %s853_s29  ;;  %419 = vrot.lane.b32.xlu0 %v50_v1, %s853_s29  ;;  %v90_v1 = vrot.slane %v73_v43, %v932_v12 }
  0x64   :  { %425 = vrot.lane.b32.xlu1 %v55_v2, %s853_s29  ;;  %423 = vrot.lane.b32.xlu0 %v51_v0, %s853_s29  ;;  %v86_v0 = vrot.slane %v73_v43, %v939_v20  ;;  %v173_v2 = vld [vmem:[#allocation7 + $0x2] ss:$8 sm:$0xf] }
  0x68   :  { %489 = vperm.xlu0 %764, %v485_v5   ;;  %494 = vperm.xlu1 %765, %v486_v6  }
  0x9a   :  { %v108_v14 = vpop.permute.xlu1 %107  ;;  %v104_v15 = vpop.permute.xlu0 %103 }
  0x9e   :  { %v110_v21 = vpop.permute.xlu1 %109  ;;  %v204_v22 = vpop.permute.xlu0 %203 }
  0x9f   :  { %v112_v23 = vsel %vm111_vm0, %v108_v14, %v110_v21  ;;  %v115_v24 = vsel %vm111_vm0, %v110_v21, %v104_v15 }
  0xa0   :  { %v139_v26 = vmul.f32 %v122_v17, %v115_v24  ;;  %v142_v27 = vmul.f32 %v134_v18, %v112_v23  ;;  %v186_v23 = vrot.slane %v173_v2, %v939_v20  ;;  %v190_v24 = vrot.slane %v173_v2, %v932_v12 }
  0xa2   :  { %v147_v30 = vrot.slane %v139_v26, 4  ;;  %v150_v31 = vrot.slane %v142_v27, 4  ;;  %v206_v32 = vpop.permute.xlu1 %205  ;;  %v106_v33 = vpop.permute.xlu0 %105 }
  0xa3   :  { %v214_v35 = vsel %vm211_vm1, %v204_v22, %v206_v32  ;;  %v113_v36 = vsel %vm111_vm0, %v106_v33, %v108_v14  ;;  %v114_v37 = vsel %vm111_vm0, %v104_v15, %v106_v33  ;;  %v182_v15 = vrot.slane %v173_v2, %v934_v16 }
  0xa4   :  { %155 = vst [vmem:[#allocation2] sm:$0xf0] %v147_v30  ;;  %158 = vst [vmem:[#allocation2 + $0x18] sm:$0xf0] %v150_v31  ;;  %v240_v39 = vmul.f32 %v226_v25, %v214_v35  ;;  %v140_v40 = vmul.f32 %v126_v28, %v114_v37  ;;  %v141_v41 = vmul.f32 %v130_v29, %v113_v36 }
  0xa5   :  { %v277_v25 = vld [vmem:[#allocation7 + $0x5] ss:$8 sm:$0xf] }
  0xa6   :  { %v248_v44 = vrot.slane %v240_v39, 4  ;;  %v148_v45 = vrot.slane %v140_v40, 4  ;;  %v149_v46 = vrot.slane %v141_v41, 4  ;;  %v210_v47 = vpop.permute.xlu1 %209  ;;  %v208_v48 = vpop.permute.xlu0 %207  ;;  %v294_v39 = vrot.slane %v277_v25, %v932_v12 }
  0xa7   :  { %v215_v49 = vsel %vm211_vm1, %v210_v47, %v204_v22  ;;  %v212_v50 = vsel %vm211_vm1, %v208_v48, %v210_v47  ;;  %v213_v51 = vsel %vm211_vm1, %v206_v32, %v208_v48  ;;  %v178_v22 = vrot.slane %v173_v2, %v930_v11 }
  0xa8   :  { %256 = vst [vmem:[#allocation2 + $0x28] sm:$0xf0] %v248_v44  ;;  %156 = vst [vmem:[#allocation2 + $0x8] sm:$0xf0] %v148_v45  ;;  %v239_v52 = vmul.f32 %v222_v34, %v215_v49  ;;  %v241_v53 = vmul.f32 %v230_v38, %v213_v51  ;;  %v242_v54 = vmul.f32 %v234_v42, %v212_v50 }
  0xa9   :  { %157 = vst [vmem:[#allocation2 + $0x10] sm:$0xf0] %v149_v46  ;;  %v282_v34 = vrot.slane %v277_v25, %v930_v11  ;;  %v286_v40 = vrot.slane %v277_v25, %v934_v16  ;;  %v290_v41 = vrot.slane %v277_v25, %v939_v20  ;;  %v377_v44 = vld [vmem:[#allocation7 + $0x7] ss:$8 sm:$0xf] }
  0xaa   :  { %v247_v56 = vrot.slane %v239_v52, 4  ;;  %v249_v57 = vrot.slane %v241_v53, 4  ;;  %v250_v58 = vrot.slane %v242_v54, 4  ;;  %v61_v59 = vpop.permute.xlu1 %60  ;;  %v59_v60 = vpop.permute.xlu0 %58 }
  0xab   :  { %v71_v61 = vsel %vm68_vm2, %v59_v60, %v61_v59 }
  0xac   :  { %255 = vst [vmem:[#allocation2 + $0x20] sm:$0xf0] %v247_v56  ;;  %257 = vst [vmem:[#allocation2 + $0x30] sm:$0xf0] %v249_v57  ;;  %v96_v62 = vmul.f32 %v82_v55, %v71_v61  ;;  %v382_v55 = vrot.slane %v377_v44, %v930_v11 }
  0xad   :  { %258 = vst [vmem:[#allocation2 + $0x38] sm:$0xf0] %v250_v58 }
  0xae   :  { %100 = vst [vmem:[#allocation2 + $0x8] sm:$0xf] %v96_v62  ;;  %v65_v3 = vpop.permute.xlu1 %64  ;;  %v63_v5 = vpop.permute.xlu0 %62 }
  0xaf   :  { %v72_v6 = vsel %vm68_vm2, %v65_v3, %v59_v60  ;;  %v69_v7 = vsel %vm68_vm2, %v63_v5, %v65_v3  ;;  %v70_v8 = vsel %vm68_vm2, %v61_v59, %v63_v5 }
  0xb0   :  { %v95_v9 = vmul.f32 %v78_v63, %v72_v6  ;;  %v97_v13 = vmul.f32 %v86_v0, %v70_v8  ;;  %v98_v14 = vmul.f32 %v90_v1, %v69_v7 }
  0xb2   :  { %99 = vst [vmem:[#allocation2] sm:$0xf] %v95_v9  ;;  %101 = vst [vmem:[#allocation2 + $0x10] sm:$0xf] %v97_v13  ;;  %v162_v17 = vpop.permute.xlu1 %161  ;;  %v160_v18 = vpop.permute.xlu0 %159  ;;  %v394_v9 = vrot.slane %v377_v44, %v932_v12  ;;  %v386_v13 = vrot.slane %v377_v44, %v934_v16 }
  0xb3   :  { %102 = vst [vmem:[#allocation2 + $0x18] sm:$0xf] %v98_v14  ;;  %v170_v19 = vsel %vm167_vm3, %v160_v18, %v162_v17  ;;  %v390_v14 = vrot.slane %v377_v44, %v939_v20 }
  0xb4   :  { %v196_v21 = vmul.f32 %v182_v15, %v170_v19  ;;  %v333_v15 = vld [vmem:[#allocation7 + $0x6] ss:$8 sm:$0xf] }
  0xb5   :  { %v466_v42 = vld [vmem:[#allocation2 + $0x8] sm:$0xff] }
  0xb6   :  { %200 = vst [vmem:[#allocation2 + $0x28] sm:$0xf] %v196_v21  ;;  %v166_v26 = vpop.permute.xlu1 %165  ;;  %v164_v27 = vpop.permute.xlu0 %163 }
  0xb7   :  { %v171_v28 = vsel %vm167_vm3, %v166_v26, %v160_v18  ;;  %v168_v29 = vsel %vm167_vm3, %v164_v27, %v166_v26  ;;  %v169_v30 = vsel %vm167_vm3, %v162_v17, %v164_v27  ;;  %v338_v27 = vrot.slane %v333_v15, %v930_v11 }
  0xb8   :  { %v195_v31 = vmul.f32 %v178_v22, %v171_v28  ;;  %v197_v32 = vmul.f32 %v186_v23, %v169_v30  ;;  %v198_v33 = vmul.f32 %v190_v24, %v168_v29 }
  0xb9   :  { %v465_v56 = vld [vmem:[#allocation2] sm:$0xff]  ;;  %v467_v3 = vld [vmem:[#allocation2 + $0x10] sm:$0xff] }
  0xba   :  { %199 = vst [vmem:[#allocation2 + $0x20] sm:$0xf] %v195_v31  ;;  %201 = vst [vmem:[#allocation2 + $0x30] sm:$0xf] %v197_v32  ;;  %v266_v35 = vpop.permute.xlu1 %265  ;;  %v264_v36 = vpop.permute.xlu0 %263  ;;  %v468_v2 = vld [vmem:[#allocation2 + $0x18] sm:$0xff] }
  0xbb   :  { %202 = vst [vmem:[#allocation2 + $0x38] sm:$0xf] %v198_v33  ;;  %v274_v37 = vsel %vm271_vm4, %v264_v36, %v266_v35 }
  0xbc   :  { %v299_v38 = vmul.f32 %v282_v34, %v274_v37  ;;  %v346_v37 = vrot.slane %v333_v15, %v939_v20 }
  0xbd   :  { %v470_v43 = vld [vmem:[#allocation2 + $0x28] sm:$0xff] }
  0xbe   :  { %v307_v45 = vrot.slane %v299_v38, 4  ;;  %v270_v46 = vpop.permute.xlu1 %269  ;;  %v268_v47 = vpop.permute.xlu0 %267  ;;  %v731_v48 = vpack.c.bf16 %v470_v43, %v466_v42  ;;  %v433_v38 = vld [vmem:[#allocation7 + $0x20] ss:$8 sm:$0xf] }
  0xbf   :  { %v275_v49 = vsel %vm271_vm4, %v270_v46, %v264_v36  ;;  %v272_v50 = vsel %vm271_vm4, %v268_v47, %v270_v46  ;;  %v273_v51 = vsel %vm271_vm4, %v266_v35, %v268_v47  ;;  %v350_v35 = vrot.slane %v333_v15, %v932_v12 }
  0xc0   :  { %315 = vst [vmem:[#allocation2 + $0x40] sm:$0xf0] %v307_v45  ;;  %v302_v52 = vmul.f32 %v294_v39, %v275_v49  ;;  %v300_v53 = vmul.f32 %v286_v40, %v273_v51  ;;  %v301_v54 = vmul.f32 %v290_v41, %v272_v50  ;;  %732 = vmatprep.subr.bf16.mxu0 %v731_v48 }
  0xc1   :  { %v469_v57 = vld [vmem:[#allocation2 + $0x20] sm:$0xff]  ;;  %v471_v59 = vld [vmem:[#allocation2 + $0x30] sm:$0xff]  ;;  %v342_v36 = vrot.slane %v333_v15, %v934_v16  ;;  %v438_v47 = vrot.slane %v433_v38, %v930_v11  ;;  %v464_v15 = vld [vmem:[#allocation4 + $0x8] sm:$0xff] }
  0xc2   :  { %v472_v58 = vld [vmem:[#allocation2 + $0x38] sm:$0xff]  ;;  %v310_v60 = vrot.slane %v302_v52, 4  ;;  %v308_v61 = vrot.slane %v300_v53, 4  ;;  %v309_v62 = vrot.slane %v301_v54, 4  ;;  %v366_v63 = vpop.permute.xlu1 %365  ;;  %v364_v0 = vpop.permute.xlu0 %363  ;;  %v733_v1 = vpack.c.bf16 %v469_v57, %v465_v56 }
  0xc3   :  { %v374_v5 = vsel %vm371_vm5, %v364_v0, %v366_v63  ;;  %v739_v6 = vpack.c.bf16 %v472_v58, %v468_v2  ;;  %v741_v7 = vpack.c.bf16 %v471_v59, %v467_v3  ;;  %v450_v52 = vrot.slane %v433_v38, %v932_v12 }
  0xc4   :  { %318 = vst [vmem:[#allocation2 + $0x58] sm:$0xf0] %v310_v60  ;;  %316 = vst [vmem:[#allocation2 + $0x48] sm:$0xf0] %v308_v61  ;;  %v399_v8 = vmul.f32 %v382_v55, %v374_v5  ;;  %734 = vmatpush1.bf16.msra.mxu0 %v733_v1  ;;  %v442_v53 = vrot.slane %v433_v38, %v934_v16  ;;  %v446_v54 = vrot.slane %v433_v38, %v939_v20 }
  0xc5   :  { %317 = vst [vmem:[#allocation2 + $0x50] sm:$0xf0] %v309_v62  ;;  %740 = vmatprep.subr.bf16.mxu1 %v739_v6 }
  0xc6   :  { %v407_v17 = vrot.slane %v399_v8, 4  ;;  %742 = vmatpush1.bf16.msra.mxu1 %v741_v7  ;;  %v370_v18 = vpop.permute.xlu1 %369  ;;  %v368_v19 = vpop.permute.xlu0 %367 }
  0xc7   :  { %v375_v21 = vsel %vm371_vm5, %v370_v18, %v364_v0  ;;  %v372_v22 = vsel %vm371_vm5, %v368_v19, %v370_v18  ;;  %v373_v23 = vsel %vm371_vm5, %v366_v63, %v368_v19  ;;  %v473_v5 = vld [vmem:[#allocation2 + $0x40] sm:$0xff]  ;;  %v680_v19 = vstv %s1066_s4  ;;  %s856_s4 = smov [#allocation9]  }
  0xc8   :  { %415 = vst [vmem:[#allocation2 + $0x60] sm:$0xf0] %v407_v17  ;;  %v402_v24 = vmul.f32 %v394_v9, %v375_v21  ;;  %v400_v25 = vmul.f32 %v386_v13, %v373_v23  ;;  %v401_v26 = vmul.f32 %v390_v14, %v372_v22  ;;  %s710_s10 = sshll.u32 %s856_s4, 4  ;;  %s711_s10 = int_to_ptr.vmem [resolvable:$true] %s710_s10 }
  0xc9   :  { %s812_s11 = scalar_lea.vmem %s711_s10, 1024  ;;  %p817_p3 = scmp.lt.s32.totalorder %s711_s10, %s711_s10 }
  0xca   :  { %v410_v28 = vrot.slane %v402_v24, 4  ;;  %v408_v29 = vrot.slane %v400_v25, 4  ;;  %v409_v30 = vrot.slane %v401_v26, 4  ;;  %v322_v31 = vpop.permute.xlu1 %321  ;;  %v320_v32 = vpop.permute.xlu0 %319  ;;  %p813_p2 = scmp.ne.s32.totalorder %s711_s10, %s812_s11  ;;  %p818_p4 = scmp.lt.s32.totalorder %s812_s11, %s812_s11 }
  0xcb   :  { %v330_v33 = vsel %vm327_vm6, %v320_v32, %v322_v31  ;;  %v474_v59 = vld [vmem:[#allocation2 + $0x48] sm:$0xff]  ;;  %v476_v62 = vld [vmem:[#allocation2 + $0x58] sm:$0xff] }
  0xcc   :  { %418 = vst [vmem:[#allocation2 + $0x78] sm:$0xf0] %v410_v28  ;;  %416 = vst [vmem:[#allocation2 + $0x68] sm:$0xf0] %v408_v29  ;;  %v355_v34 = vmul.f32 %v338_v27, %v330_v33  ;;  %v475_v63 = vld [vmem:[#allocation2 + $0x50] sm:$0xff]  ;;  %p819_p5 = por %p818_p4, %p817_p3 }
  0xcd   :  { %417 = vst [vmem:[#allocation2 + $0x70] sm:$0xf0] %v409_v30 }
  0xce   :  { %359 = vst [vmem:[#allocation2 + $0x60] sm:$0xf] %v355_v34  ;;  %v326_v39 = vpop.permute.xlu1 %325  ;;  %v324_v40 = vpop.permute.xlu0 %323  ;;  %p820_p6 = pnand %p819_p5, %p813_p2 }
  0xcf   :  { %v331_v41 = vsel %vm327_vm6, %v326_v39, %v320_v32  ;;  %v328_v42 = vsel %vm327_vm6, %v324_v40, %v326_v39  ;;  %v329_v43 = vsel %vm327_vm6, %v322_v31, %v324_v40 }
  0xd0   :  { %v358_v44 = vmul.f32 %v350_v35, %v331_v41  ;;  %v356_v45 = vmul.f32 %v342_v36, %v329_v43  ;;  %v357_v46 = vmul.f32 %v346_v37, %v328_v42 }
  0xd2   :  { %362 = vst [vmem:[#allocation2 + $0x78] sm:$0xf] %v358_v44  ;;  %360 = vst [vmem:[#allocation2 + $0x68] sm:$0xf] %v356_v45  ;;  %v422_v48 = vpop.permute.xlu1 %421  ;;  %v420_v49 = vpop.permute.xlu0 %419 }
  0xd3   :  { %361 = vst [vmem:[#allocation2 + $0x70] sm:$0xf] %v357_v46  ;;  %v430_v50 = vsel %vm427_vm7, %v420_v49, %v422_v48 }
  0xd4   :  { %v455_v51 = vmul.f32 %v438_v47, %v430_v50 }
  0xd5   :  { %v477_v16 = vld [vmem:[#allocation2 + $0x60] sm:$0xff] }
  0xd6   :  { %459 = vst [vmem:[#allocation2 + $0x80] sm:$0xf] %v455_v51  ;;  %v426_v55 = vpop.permute.xlu1 %425  ;;  %v424_v56 = vpop.permute.xlu0 %423  ;;  %v737_v7 = vpack.c.bf16 %v477_v16, %v473_v5 }
  0xd7   :  { %v431_v11 = vsel %vm427_vm7, %v426_v55, %v420_v49  ;;  %v428_v57 = vsel %vm427_vm7, %v424_v56, %v426_v55  ;;  %v429_v58 = vsel %vm427_vm7, %v422_v48, %v424_v56 }
  0xd8   :  { %v458_v60 = vmul.f32 %v450_v52, %v431_v11  ;;  %v456_v61 = vmul.f32 %v442_v53, %v429_v58  ;;  %v457_v12 = vmul.f32 %v446_v54, %v428_v57 }
  0xd9   :  { %v478_v20 = vld [vmem:[#allocation2 + $0x68] sm:$0xff]  ;;  %v480_v0 = vld [vmem:[#allocation2 + $0x78] sm:$0xff] }
  0xda   :  { %v479_v1 = vld [vmem:[#allocation2 + $0x70] sm:$0xff]  ;;  %462 = vst [vmem:[#allocation2 + $0x98] sm:$0xf] %v458_v60  ;;  %460 = vst [vmem:[#allocation2 + $0x88] sm:$0xf] %v456_v61  ;;  %v735_v2 = vpack.c.bf16 %v478_v20, %v474_v59  ;;  %v743_v3 = vpack.c.bf16 %v480_v0, %v476_v62 }
  0xdb   :  { %461 = vst [vmem:[#allocation2 + $0x90] sm:$0xf] %v457_v12  ;;  %v745_v6 = vpack.c.bf16 %v479_v1, %v475_v63 }
  0xdc   :  { %736 = vmatprep.subr.bf16.mxu0 %v735_v2  ;;  %744 = vmatprep.subr.bf16.mxu1 %v743_v3 }
  0xdd   :  { %738 = vmatpush1.bf16.msra.mxu0 %v737_v7  ;;  %746 = vmatpush1.bf16.msra.mxu1 %v745_v6  ;;  %v481_v14 = vld [vmem:[#allocation2 + $0x80] sm:$0xf] }
  0xe1   :  { %v482_v8 = vld [vmem:[#allocation2 + $0x88] sm:$0xf]  ;;  %v484_v9 = vld [vmem:[#allocation2 + $0x98] sm:$0xf] }
  0xe2   :  { %v483_v13 = vld [vmem:[#allocation2 + $0x90] sm:$0xf]  ;;  %723 = vmatprep.subr.msk.mxu0 %vm504_vm8, %v482_v8  ;;  %727 = vmatprep.subr.msk.mxu1 %vm504_vm8, %v484_v9 }
  0xe3   :  { %724 = vmatpush1.msk.msra.mxu0 %vm504_vm8, %v481_v14  ;;  %728 = vmatpush1.msk.msra.mxu1 %vm504_vm8, %v483_v13 }
  0xe4   :  { %725 = vmatmul.mubr.msk.f32.vlgmr.msra.gmra.mrb[0].mxu0 %vm497_vm9, %v463_v10  ;;  %729 = vmatmul.mubr.msk.f32.vlgmr.msra.gmra.mrb[0].mxu1 %vm497_vm9, %v463_v10 }
  0xe5   :  { %587 = vmatprep.mubr.f32.mxu0 %v854_v4  ;;  %664 = vmatprep.mubr.f32.mxu1 %v854_v4 }
  0xe7   :  { %v490_v17 = vpop.permute.xlu0 %489  ;;  %v495_v28 = vpop.permute.xlu1 %494 }
  0xe8   :  { %726 = vmatmul.mubr.msk.f32.gmra.mrb[2].mxu0 %vm497_vm9, %v464_v15  ;;  %730 = vmatmul.mubr.msk.f32.gmra.mrb[2].mxu1 %vm497_vm9, %v464_v15 }
 0x1b7   :  { %v660_v18 = vpop.f32.mrb[0].mxu1  ;;  %v583_v21 = vpop.f32.mrb[0].mxu0 }
 0x1b8   :  { %v661_v22 = vadd.f32 %v660_v18, %v490_v17  ;;  %v584_v23 = vadd.f32 %v583_v21, %v490_v17  ;;  %v585_v24 = vpop.f32.mrb[1].mxu0  ;;  %v662_v25 = vpop.f32.mrb[1].mxu1 }
 0x1b9   :  { %v586_v26 = vadd.f32 %v585_v24, %v490_v17  ;;  %v663_v27 = vadd.f32 %v662_v25, %v490_v17 }
 0x1ba   :  { %vm674_vm10 = vcmp.ge.f32.partialorder %v661_v22, 0.0  ;;  %v683_v29 = vmul.f32 %v680_v19, %v661_v22  ;;  %vm672_vm11 = vcmp.ge.f32.partialorder %v584_v23, 0.0  ;;  %v681_v4 = vmul.f32 %v680_v19, %v584_v23 }
 0x1bb   :  { %vm673_vm12 = vcmp.ge.f32.partialorder %v586_v26, 0.0  ;;  %v682_v30 = vmul.f32 %v680_v19, %v586_v26  ;;  %vm675_vm13 = vcmp.ge.f32.partialorder %v663_v27, 0.0  ;;  %v684_v31 = vmul.f32 %v680_v19, %v663_v27  ;;  %v589_v32 = vpop.f32.mrb[2].mxu0  ;;  %v666_v33 = vpop.f32.mrb[2].mxu1 }
 0x1bc   :  { %v691_v34 = vsel %vm674_vm10, %v661_v22, %v683_v29  ;;  %v689_v35 = vsel %vm672_vm11, %v584_v23, %v681_v4  ;;  %v590_v36 = vadd.f32 %v589_v32, %v495_v28  ;;  %v667_v37 = vadd.f32 %v666_v33, %v495_v28  ;;  %v591_v38 = vpop.f32.mrb[3].mxu0  ;;  %v668_v39 = vpop.f32.mrb[3].mxu1 }
 0x1bd   :  { %699 = vst [vmem:[#allocation9 + $0x10] sm:$0xff] %v691_v34  ;;  %697 = vst [vmem:[#allocation9] sm:$0xff] %v689_v35  ;;  %v690_v40 = vsel %vm673_vm12, %v586_v26, %v682_v30  ;;  %v692_v41 = vsel %vm675_vm13, %v663_v27, %v684_v31  ;;  %v592_v42 = vadd.f32 %v591_v38, %v495_v28 }
 0x1be   :  { %v669_v43 = vadd.f32 %v668_v39, %v495_v28  ;;  %698 = vst [vmem:[#allocation9 + $0x8] sm:$0xff] %v690_v40  ;;  %700 = vst [vmem:[#allocation9 + $0x18] sm:$0xff] %v692_v41  ;;  %vm676_vm14 = vcmp.ge.f32.partialorder %v590_v36, 0.0  ;;  %v685_v44 = vmul.f32 %v680_v19, %v590_v36  ;;  %vm678_vm15 = vcmp.ge.f32.partialorder %v667_v37, 0.0 }
 0x1bf   :  { %v687_v45 = vmul.f32 %v680_v19, %v667_v37  ;;  %vm677_vm0 = vcmp.ge.f32.partialorder %v592_v42, 0.0  ;;  %v686_v46 = vmul.f32 %v680_v19, %v592_v42 }
 0x1c0   :  { %vm679_vm1 = vcmp.ge.f32.partialorder %v669_v43, 0.0  ;;  %v688_v47 = vmul.f32 %v680_v19, %v669_v43  ;;  %v693_v48 = vsel %vm676_vm14, %v590_v36, %v685_v44 }
 0x1c1   :  { %v695_v49 = vsel %vm678_vm15, %v667_v37, %v687_v45  ;;  %701 = vst [vmem:[#allocation9 + $0x20] sm:$0xff] %v693_v48  ;;  %v694_v50 = vsel %vm677_vm0, %v592_v42, %v686_v46 }
 0x1c2   :  { %703 = vst [vmem:[#allocation9 + $0x30] sm:$0xff] %v695_v49  ;;  %v696_v51 = vsel %vm679_vm1, %v669_v43, %v688_v47  ;;  %702 = vst [vmem:[#allocation9 + $0x28] sm:$0xff] %v694_v50 }
 0x1c3   :  { %704 = vst [vmem:[#allocation9 + $0x38] sm:$0xff] %v696_v51 }
 0x1c4   :  { %823 = shalt.err (!%p820_p6)
}
 0x1c5   :  { %s824_s14 = scalar_lea.hbm %s1067_s5, 1024 }
 0x1c6   :  { %p825_p7 = scmp.ne.s32.totalorder %s1067_s5, %s824_s14  ;;  %p828_p8 = scmp.lt.u32.totalorder %s824_s14, %s1067_s5 }
 0x1c8   :  { %p830_p9 = pnand %p828_p8, %p825_p7 }
 0x1ca   :  { %833 = shalt.err (!%p830_p9)
}
 0x1cb   :  { %716 = dma.vmem_to_hbm [thread:$0]  %s711_s10, 1024, %s1067_s5, [#allocation6], %s844_s1, %s844_s1, %s845_s17  }
 0x1cc   :  { %838 = dma.done.wait [#allocation6], 1024  }
 0x1cd   :  { %839 = vsyncadd [#allocation6], 4294966272 }
 0x1ce   :  { %720 = vsyncpa [#allocation5], 1 }
 0x1cf   :  { %721 = vsyncpa [#allocation8], 1 }
 0x1d0   :  { %722 = vsyncpa [#allocation6], 1 }

</bundles_post_ra>
